<compile_context>
chip_gen: v7x
topology: tpu7x:2x2x1
jax: 0.10.0
libtpu: 0.0.40
codegen_flags: <defaults>
</compile_context>

<pallas_src>
import jax
import jax.numpy as jnp
from jax.experimental import pallas as pl
from jax.experimental.pallas import tpu as pltpu

STATE_DIM = 16
ACTION_DIM = 4

H1 = 400
H2 = 300

# Lane-padded sizes (multiples of 128).
H1_PAD = 512
H2_PAD = 384
ACT_PAD = 128

MATMUL_DTYPE = jnp.bfloat16   # MXU input dtype (f32 accumulation)
OUT_DTYPE = jnp.bfloat16      # kernel output dtype (tanh in [-1, 1])


def _round_up(n, m):
    return ((n + m - 1) // m) * m


def actor_kernel(x_ref, w1_ref, b1_ref, w2_ref, b2_ref, w3_ref, b3_ref, o_ref):
    # x arrives f32; cast to bf16 in-kernel (saves a wrapper-side cast pass).
    x = x_ref[...].astype(MATMUL_DTYPE)
    # layer1: (TB, S) @ (S, 512) -> +bias -> relu   (f32 accumulate / elementwise)
    h1 = jnp.dot(x, w1_ref[...], preferred_element_type=jnp.float32)
    h1 = jnp.maximum(h1 + b1_ref[...], 0.0)
    # layer2: (TB, 512) @ (512, 384) -> +bias -> relu
    h2 = jnp.dot(h1.astype(MATMUL_DTYPE), w2_ref[...],
                 preferred_element_type=jnp.float32)
    h2 = jnp.maximum(h2 + b2_ref[...], 0.0)
    # layer3: (TB, 384) @ (384, 128) -> +bias -> tanh -> bf16 lane-dense store
    h3 = jnp.dot(h2.astype(MATMUL_DTYPE), w3_ref[...],
                 preferred_element_type=jnp.float32)
    o_ref[...] = jnp.tanh(h3 + b3_ref[...]).astype(o_ref.dtype)


def _choose_tb(B):
    """Batch tile: single block for small B; for B >= 256 guarantee >= 2 blocks
    (v7x has two TensorCores) with tiles that are multiples of 128, capped at
    1024 rows (per-step compute >> 0.35 us step overhead, VMEM stays small)."""
    if B < 256:
        return _round_up(max(B, 8), 8)
    return min(1024, _round_up(pl.cdiv(B, 2), 128))


def actor_forward(x, params, *, tb=None, out_dtype=OUT_DTYPE):
    """x: (B, state_dim) f32.  params: padded params from prepare_params."""
    B, S = x.shape
    w1, b1, w2, b2, w3, b3 = (
        params["w1"], params["b1"], params["w2"], params["b2"],
        params["w3"], params["b3"],
    )

    if tb is None:
        tb = _choose_tb(B)
    grid_b = pl.cdiv(B, tb)
    b_pad = grid_b * tb

    # Only materialize a pad when the batch is ragged w.r.t. the tile.
    x_in = x if b_pad == B else jnp.pad(x, ((0, b_pad - B), (0, 0)))

    # Weights/biases: full-extent blocks with constant index_map -> stay
    # VMEM-resident across all grid steps.
    resident = lambda a: pl.BlockSpec(a.shape, lambda i: (0,) * a.ndim)

    out = pl.pallas_call(
        actor_kernel,
        out_shape=jax.ShapeDtypeStruct((b_pad, ACT_PAD), out_dtype),
        grid=(grid_b,),
        in_specs=[
            pl.BlockSpec((tb, S), lambda i: (i, 0)),   # x: blocked on batch
            resident(w1), resident(b1),
            resident(w2), resident(b2),
            resident(w3), resident(b3),
        ],
        out_specs=pl.BlockSpec((tb, ACT_PAD), lambda i: (i, 0)),
        compiler_params=pltpu.CompilerParams(dimension_semantics=("parallel",)),
    )(x_in, w1, b1, w2, b2, w3, b3)

    # Strip batch + lane padding (layout plumbing; fuses into the consumer).
    return out[:B, :ACTION_DIM]


def init_params(key, state_dim=STATE_DIM, action_dim=ACTION_DIM):
    """Unpadded f32 params mirroring torch.nn.Linear default init:
    U(-1/sqrt(fan_in), 1/sqrt(fan_in)) for both weight and bias.
    Weights are (in_features, out_features)."""
    def linear(key, fan_in, fan_out):
        kw, kb = jax.random.split(key)
        bound = 1.0 / jnp.sqrt(jnp.float32(fan_in))
        w = jax.random.uniform(kw, (fan_in, fan_out), jnp.float32, -bound, bound)
        b = jax.random.uniform(kb, (1, fan_out), jnp.float32, -bound, bound)
        return w, b

    k1, k2, k3 = jax.random.split(key, 3)
    w1, b1 = linear(k1, state_dim, H1)
    w2, b2 = linear(k2, H1, H2)
    w3, b3 = linear(k3, H2, action_dim)
    return {"w1": w1, "b1": b1, "w2": w2, "b2": b2, "w3": w3, "b3": b3}


def prepare_params(raw):
    """Zero-pad hidden/output dims to lane multiples and cast weights to bf16.
    Padding with zeros is exact: zero weight rows/cols contribute nothing and
    relu(0 + 0) = 0, so padded activations stay zero."""
    def pad2(a, rows, cols):
        out = jnp.zeros((rows, cols), a.dtype)
        return out.at[: a.shape[0], : a.shape[1]].set(a)

    w1 = pad2(raw["w1"], STATE_DIM, H1_PAD).astype(MATMUL_DTYPE)
    b1 = pad2(raw["b1"], 1, H1_PAD)                              # f32
    w2 = pad2(raw["w2"], H1_PAD, H2_PAD).astype(MATMUL_DTYPE)
    b2 = pad2(raw["b2"], 1, H2_PAD)                              # f32
    w3 = pad2(raw["w3"], H2_PAD, ACT_PAD).astype(MATMUL_DTYPE)
    b3 = pad2(raw["b3"], 1, ACT_PAD)                             # f32
    return {"w1": w1, "b1": b1, "w2": w2, "b2": b2, "w3": w3, "b3": b3}


def actor_reference_f32(x, raw):
    """Pure f32 reference on unpadded params (semantic reference)."""
    h1 = jnp.maximum(x @ raw["w1"] + raw["b1"], 0.0)
    h2 = jnp.maximum(h1 @ raw["w2"] + raw["b2"], 0.0)
    return jnp.tanh(h2 @ raw["w3"] + raw["b3"])


def actor_reference_matched(x, p, out_dtype=OUT_DTYPE):
    """Pure-JAX reference using the same bf16-matmul / f32-accumulate / bf16
    output recipe as the kernel (for tight numerical comparison)."""
    h1 = jnp.dot(x.astype(MATMUL_DTYPE), p["w1"], preferred_element_type=jnp.float32)
    h1 = jnp.maximum(h1 + p["b1"], 0.0)
    h2 = jnp.dot(h1.astype(MATMUL_DTYPE), p["w2"], preferred_element_type=jnp.float32)
    h2 = jnp.maximum(h2 + p["b2"], 0.0)
    h3 = jnp.dot(h2.astype(MATMUL_DTYPE), p["w3"], preferred_element_type=jnp.float32)
    return jnp.tanh(h3 + p["b3"]).astype(out_dtype)[:, :ACTION_DIM]


if __name__ == "__main__":
    key = jax.random.PRNGKey(0)
    kx, kp = jax.random.split(key)

    B = 32  # small demo batch; tiling / dual-TC split engages at B >= 256
    x = jax.random.normal(kx, (B, STATE_DIM), jnp.float32)
    raw = init_params(kp)
    params = prepare_params(raw)

    out = jax.block_until_ready(actor_forward(x, params))

    assert out.shape == (B, ACTION_DIM), out.shape

    out_f32 = out.astype(jnp.float32)
    ref_matched = actor_reference_matched(x, params).astype(jnp.float32)
    ref_f32 = actor_reference_f32(x, raw)

    assert jnp.allclose(out_f32, ref_matched, atol=1e-2, rtol=1e-2), (
        "mismatch vs bf16-matched reference: "
        f"max abs diff {float(jnp.max(jnp.abs(out_f32 - ref_matched)))}"
    )
    assert jnp.allclose(out_f32, ref_f32, atol=5e-2, rtol=5e-2), (
        "mismatch vs f32 reference: "
        f"max abs diff {float(jnp.max(jnp.abs(out_f32 - ref_f32)))}"
    )

    print("KERNEL_OK")
</pallas_src>

<mosaic_0001>
module attributes {stable_mosaic.version = 11 : i64} {
  func.func @actor_kernel(%arg0: i32, %arg1: memref<32x16xf32, #tpu.memory_space<vmem>>, %arg2: memref<16x512xbf16, #tpu.memory_space<vmem>>, %arg3: memref<1x512xf32, #tpu.memory_space<vmem>>, %arg4: memref<512x384xbf16, #tpu.memory_space<vmem>>, %arg5: memref<1x384xf32, #tpu.memory_space<vmem>>, %arg6: memref<384x128xbf16, #tpu.memory_space<vmem>>, %arg7: memref<1x128xf32, #tpu.memory_space<vmem>>, %arg8: memref<32x128xbf16, #tpu.memory_space<vmem>>) attributes {dimension_semantics = [#tpu.dimension_semantics<parallel>], iteration_bounds = array<i64: 1>, scalar_prefetch = 0 : i64, scratch_operands = 0 : i64, tpu.core_type = #tpu.core_type<tc>, window_params = [{transform_indices = @transform_0, window_bounds = array<i64: 32, 16>}, {pipeline_mode = #tpu.pipeline_mode<synchronous>, transform_indices = @transform_1, window_bounds = array<i64: 16, 512>}, {pipeline_mode = #tpu.pipeline_mode<synchronous>, transform_indices = @transform_2, window_bounds = array<i64: 1, 512>}, {pipeline_mode = #tpu.pipeline_mode<synchronous>, transform_indices = @transform_3, window_bounds = array<i64: 512, 384>}, {pipeline_mode = #tpu.pipeline_mode<synchronous>, transform_indices = @transform_4, window_bounds = array<i64: 1, 384>}, {pipeline_mode = #tpu.pipeline_mode<synchronous>, transform_indices = @transform_5, window_bounds = array<i64: 384, 128>}, {pipeline_mode = #tpu.pipeline_mode<synchronous>, transform_indices = @transform_6, window_bounds = array<i64: 1, 128>}, {transform_indices = @transform_7, window_bounds = array<i64: 32, 128>}]} {
    %c0 = arith.constant 0 : index
    %c0_0 = arith.constant 0 : index
    %0 = vector.load %arg1[%c0, %c0_0] : memref<32x16xf32, #tpu.memory_space<vmem>>, vector<32x16xf32>
    %1 = arith.truncf %0 : vector<32x16xf32> to vector<32x16xbf16>
    %c0_1 = arith.constant 0 : index
    %c0_2 = arith.constant 0 : index
    %2 = vector.load %arg2[%c0_1, %c0_2] : memref<16x512xbf16, #tpu.memory_space<vmem>>, vector<16x512xbf16>
    %cst = arith.constant dense<0.000000e+00> : vector<32x512xf32>
    %3 = tpu.matmul %1, %2, %cst {dimension_numbers = #tpu.dot_dimension_numbers<[1], [0], [0], [1], [0, 0, 1, 1], [], []>} : vector<32x16xbf16>, vector<16x512xbf16>, vector<32x512xf32> -> vector<32x512xf32>
    %c0_3 = arith.constant 0 : index
    %c0_4 = arith.constant 0 : index
    %4 = vector.load %arg3[%c0_3, %c0_4] : memref<1x512xf32, #tpu.memory_space<vmem>>, vector<1x512xf32>
    %5 = vector.broadcast %4 : vector<1x512xf32> to vector<32x512xf32>
    %6 = arith.addf %3, %5 : vector<32x512xf32>
    %cst_5 = arith.constant 0.000000e+00 : f32
    %7 = vector.broadcast %cst_5 : f32 to vector<32x512xf32>
    %8 = arith.maximumf %6, %7 : vector<32x512xf32>
    %9 = arith.truncf %8 : vector<32x512xf32> to vector<32x512xbf16>
    %c0_6 = arith.constant 0 : index
    %c0_7 = arith.constant 0 : index
    %10 = vector.load %arg4[%c0_6, %c0_7] : memref<512x384xbf16, #tpu.memory_space<vmem>>, vector<512x384xbf16>
    %cst_8 = arith.constant dense<0.000000e+00> : vector<32x384xf32>
    %11 = tpu.matmul %9, %10, %cst_8 {dimension_numbers = #tpu.dot_dimension_numbers<[1], [0], [0], [1], [0, 0, 1, 1], [], []>} : vector<32x512xbf16>, vector<512x384xbf16>, vector<32x384xf32> -> vector<32x384xf32>
    %c0_9 = arith.constant 0 : index
    %c0_10 = arith.constant 0 : index
    %12 = vector.load %arg5[%c0_9, %c0_10] : memref<1x384xf32, #tpu.memory_space<vmem>>, vector<1x384xf32>
    %13 = vector.broadcast %12 : vector<1x384xf32> to vector<32x384xf32>
    %14 = arith.addf %11, %13 : vector<32x384xf32>
    %cst_11 = arith.constant 0.000000e+00 : f32
    %15 = vector.broadcast %cst_11 : f32 to vector<32x384xf32>
    %16 = arith.maximumf %14, %15 : vector<32x384xf32>
    %17 = arith.truncf %16 : vector<32x384xf32> to vector<32x384xbf16>
    %c0_12 = arith.constant 0 : index
    %c0_13 = arith.constant 0 : index
    %18 = vector.load %arg6[%c0_12, %c0_13] : memref<384x128xbf16, #tpu.memory_space<vmem>>, vector<384x128xbf16>
    %cst_14 = arith.constant dense<0.000000e+00> : vector<32x128xf32>
    %19 = tpu.matmul %17, %18, %cst_14 {dimension_numbers = #tpu.dot_dimension_numbers<[1], [0], [0], [1], [0, 0, 1, 1], [], []>} : vector<32x384xbf16>, vector<384x128xbf16>, vector<32x128xf32> -> vector<32x128xf32>
    %c0_15 = arith.constant 0 : index
    %c0_16 = arith.constant 0 : index
    %20 = vector.load %arg7[%c0_15, %c0_16] : memref<1x128xf32, #tpu.memory_space<vmem>>, vector<1x128xf32>
    %21 = vector.broadcast %20 : vector<1x128xf32> to vector<32x128xf32>
    %22 = arith.addf %19, %21 : vector<32x128xf32>
    %23 = math.tanh %22 : vector<32x128xf32>
    %24 = arith.truncf %23 : vector<32x128xf32> to vector<32x128xbf16>
    %c0_17 = arith.constant 0 : index
    %c0_18 = arith.constant 0 : index
    %25 = vector.load %arg8[%c0_17, %c0_18] : memref<32x128xbf16, #tpu.memory_space<vmem>>, vector<32x128xbf16>
    tpu.vector_store %arg8[%c0_17, %c0_18], %24 {strides = array<i32>} : memref<32x128xbf16, #tpu.memory_space<vmem>>, vector<32x128xbf16>,
    return
  }
  func.func @transform_0(%arg0: i32) -> (i32, i32) {
    %c0_i32 = arith.constant 0 : i32
    %c0_i32_0 = arith.constant 0 : i32
    return %arg0, %c0_i32 : i32, i32
  }
  func.func @transform_1(%arg0: i32) -> (i32, i32) {
    %c0_i32 = arith.constant 0 : i32
    %c0_i32_0 = arith.constant 0 : i32
    %c0_i32_1 = arith.constant 0 : i32
    return %c0_i32, %c0_i32_0 : i32, i32
  }
  func.func @transform_2(%arg0: i32) -> (i32, i32) {
    %c0_i32 = arith.constant 0 : i32
    %c0_i32_0 = arith.constant 0 : i32
    %c0_i32_1 = arith.constant 0 : i32
    return %c0_i32, %c0_i32_0 : i32, i32
  }
  func.func @transform_3(%arg0: i32) -> (i32, i32) {
    %c0_i32 = arith.constant 0 : i32
    %c0_i32_0 = arith.constant 0 : i32
    %c0_i32_1 = arith.constant 0 : i32
    return %c0_i32, %c0_i32_0 : i32, i32
  }
  func.func @transform_4(%arg0: i32) -> (i32, i32) {
    %c0_i32 = arith.constant 0 : i32
    %c0_i32_0 = arith.constant 0 : i32
    %c0_i32_1 = arith.constant 0 : i32
    return %c0_i32, %c0_i32_0 : i32, i32
  }
  func.func @transform_5(%arg0: i32) -> (i32, i32) {
    %c0_i32 = arith.constant 0 : i32
    %c0_i32_0 = arith.constant 0 : i32
    %c0_i32_1 = arith.constant 0 : i32
    return %c0_i32, %c0_i32_0 : i32, i32
  }
  func.func @transform_6(%arg0: i32) -> (i32, i32) {
    %c0_i32 = arith.constant 0 : i32
    %c0_i32_0 = arith.constant 0 : i32
    %c0_i32_1 = arith.constant 0 : i32
    return %c0_i32, %c0_i32_0 : i32, i32
  }
  func.func @transform_7(%arg0: i32) -> (i32, i32) {
    %c0_i32 = arith.constant 0 : i32
    %c0_i32_0 = arith.constant 0 : i32
    return %arg0, %c0_i32 : i32, i32
  }
}

</mosaic_0001>

<bundles_post_ra>
// kernel: tpu_custom_call.1
= control target key start
LH: loop header
LB: loop body
LE: loop exit
PB: predicated region body
PF: predicated region fallthrough
CT: control target
= control target key end

     0   :  { %12 = vsyncpa [#allocation3], 0  ;;  %s2160_s0 = inlined_call_operand.vmem [shape: f32[32,16], index: 0, kind: input, shape index: {}]   ;;  %s2161_s1 = inlined_call_operand.vmem [shape: bf16[16,512], index: 1, kind: input, shape index: {}]   ;;  %s2162_s2 = inlined_call_operand.vmem [shape: f32[1,512], index: 2, kind: input, shape index: {}]   ;;  %s2163_s3 = inlined_call_operand.hbm [shape: bf16[512,384], index: 3, kind: input, shape index: {}]   ;;  %s2164_s4 = inlined_call_operand.vmem [shape: f32[1,384], index: 4, kind: input, shape index: {}]   ;;  %s2165_s5 = inlined_call_operand.hbm [shape: bf16[384,128], index: 5, kind: input, shape index: {}]   ;;  %s2166_s6 = inlined_call_operand.vmem [shape: f32[1,128], index: 6, kind: input, shape index: {}]   ;;  %s2167_s7 = inlined_call_operand.hbm [shape: bf16[32,128], index: 7, kind: output, shape index: {}]  }
   0x1   :  { %13 = vsyncpa [#allocation6], 0 }
   0x2   :  { %14 = vsyncpa [#allocation4], 0  ;;  %s1987_s24 = smov [#allocation2]   ;;  %s1915_s28 = scalar_lea.hbm %s2163_s3, 12288 }
   0x3   :  { %s26_s25 = sshll.u32 %s1987_s24, 4  ;;  %p1916_p0 = scmp.ne.s32.totalorder %s2163_s3, %s1915_s28  ;;  %s27_s25 = int_to_ptr.vmem [resolvable:$true] %s26_s25 }
   0x4   :  { %p1919_p1 = scmp.lt.u32.totalorder %s1915_s28, %s2163_s3 }
   0x6   :  { %p1921_p2 = pnand %p1919_p1, %p1916_p0 }
   0x8   :  { %1924 = shalt.err (!%p1921_p2)
}
   0x9   :  { %s1925_s10 = scalar_lea.vmem %s27_s25, 12288  ;;  %p1930_p4 = scmp.lt.s32.totalorder %s27_s25, %s27_s25 }
   0xa   :  { %p1926_p3 = scmp.ne.s32.totalorder %s27_s25, %s1925_s10  ;;  %p1931_p5 = scmp.lt.s32.totalorder %s1925_s10, %s1925_s10 }
   0xc   :  { %p1932_p6 = por %p1931_p5, %p1930_p4 }
   0xe   :  { %p1933_p7 = pnand %p1932_p6, %p1926_p3 }
  0x10   :  { %1936 = shalt.err (!%p1933_p7)
}
  0x11   :  { %s1988_s11 = smov 192   ;;  %s1989_s12 = smov 12  }
  0x12   :  { %32 = dma.hbm_to_vmem [thread:$0]  %s2163_s3, 12288, %s27_s25, [#allocation3], %s1988_s11, %s1988_s11, %s1989_s12  }
  0x13   :  { %s1990_s15 = smov [#allocation5]   ;;  %s1937_s19 = scalar_lea.hbm %s2165_s5, 3072 }
  0x14   :  { %s40_s16 = sshll.u32 %s1990_s15, 4  ;;  %p1938_p8 = scmp.ne.s32.totalorder %s2165_s5, %s1937_s19  ;;  %s41_s16 = int_to_ptr.vmem [resolvable:$true] %s40_s16 }
  0x15   :  { %p1941_p9 = scmp.lt.u32.totalorder %s1937_s19, %s2165_s5 }
  0x17   :  { %p1943_p10 = pnand %p1941_p9, %p1938_p8 }
  0x19   :  { %1946 = shalt.err (!%p1943_p10)
}
  0x1a   :  { %s1947_s24 = scalar_lea.vmem %s41_s16, 3072  ;;  %p1952_p12 = scmp.lt.s32.totalorder %s41_s16, %s41_s16 }
  0x1b   :  { %p1948_p11 = scmp.ne.s32.totalorder %s41_s16, %s1947_s24  ;;  %p1953_p13 = scmp.lt.s32.totalorder %s1947_s24, %s1947_s24 }
  0x1d   :  { %p1954_p0 = por %p1953_p13, %p1952_p12 }
  0x1f   :  { %p1955_p1 = pnand %p1954_p0, %p1948_p11 }
  0x21   :  { %1958 = shalt.err (!%p1955_p1)
}
  0x22   :  { %s1991_s3 = smov 64   ;;  %s1992_s25 = smov 4  }
  0x23   :  { %46 = dma.hbm_to_vmem [thread:$0]  %s2165_s5, 3072, %s41_s16, [#allocation6], %s1991_s3, %s1991_s3, %s1992_s25  }
  0x24   :  { %1981 = dma.done.wait [#allocation3], 12288  }
  0x25   :  { %1982 = vsyncadd [#allocation3], 4294955008 }
  0x26   :  { %1983 = dma.done.wait [#allocation6], 3072  }
  0x27   :  { %1984 = vsyncadd [#allocation6], 4294964224  ;;  %v1993_v0 = vmov 0   ;;  %v1749_v1 = vld [vmem:[%s2161_s1 + $0x4] ss:$16 sps:$4 sm:$0xff]   ;;  %v57_v4 = vld [vmem:[%s2160_s0 + $0x8] sm:$0xff]  ;;  %v68_v61 = vlaneseq }
  0x28   :  { %147 = vmatprep.mubr.bf16.mxu0 %v1993_v0  ;;  %200 = vmatprep.mubr.bf16.mxu1 %v1993_v0  ;;  %v1751_v2 = vld [vmem:[%s2161_s1] ss:$16 sps:$4 sm:$0xff]   ;;  %vm108_vm0 = vcmask 130048   ;;  %v1752_v6 = vld [vmem:[%s2161_s1 + $0xc] ss:$16 sps:$4 sm:$0xff]   ;;  %s1994_s22 = smov [#allocation7]  }
  0x29   :  { %v56_v3 = vld [vmem:[%s2160_s0] sm:$0xff]  ;;  %115 = vmatprep.subr.bf16.mxu0 %v1749_v1  ;;  %v1754_v7 = vld [vmem:[%s2161_s1 + $0x8] ss:$16 sps:$4 sm:$0xff]   ;;  %168 = vmatprep.subr.bf16.mxu1 %v1752_v6  ;;  %v58_v11 = vld [vmem:[%s2160_s0 + $0x10] sm:$0xff]  ;;  %v2090_v62 = vshrl.u32 %v68_v61, 7 }
  0x2a   :  { %v60_v5 = vpack.c.bf16 %v57_v4, %v56_v3  ;;  %116 = vmatpush1.bf16.msra.mxu0 %v1751_v2  ;;  %v1755_v8 = vld [vmem:[#allocation2] ss:$12 sps:$4 sm:$0xff]   ;;  %v1757_v9 = vld [vmem:[#allocation2 + $0x4] ss:$12 sps:$4 sm:$0xff]   ;;  %169 = vmatpush1.bf16.msra.mxu1 %v1754_v7  ;;  %v1760_v10 = vld [vmem:[#allocation2 + $0x1c] ss:$12 sps:$4 sm:$0xff]  }
  0x2b   :  { %v59_v12 = vld [vmem:[%s2160_s0 + $0x18] sm:$0xff]  ;;  %902 = vmatprep.subr.bf16.mxu0 %v1757_v9  ;;  %v1763_v14 = vld [vmem:[#allocation2 + $0x34] ss:$12 sps:$4 sm:$0xff]   ;;  %v1769_v19 = vld [vmem:[#allocation2 + $0x64] ss:$12 sps:$4 sm:$0xff]   ;;  %v70_v63 = vsub.s32 0, %v2090_v62 }
  0x2c   :  { %v1758_v13 = vld [vmem:[#allocation2 + $0x18] ss:$12 sps:$4 sm:$0xff]   ;;  %v61_v15 = vpack.c.bf16 %v59_v12, %v58_v11  ;;  %v1761_v16 = vld [vmem:[#allocation2 + $0x30] ss:$12 sps:$4 sm:$0xff]   ;;  %v1764_v18 = vld [vmem:[#allocation2 + $0x48] ss:$12 sps:$4 sm:$0xff]  }
  0x2d   :  { %1467 = vmatmul.mubr.msk.bf16.vlgmr.msra.gmra.mrb[0].mxu0 %vm108_vm0, %v60_v5  ;;  %1469 = vmatmul.mubr.msk.bf16.vlgmr.msra.gmra.mrb[0].mxu1 %vm108_vm0, %v60_v5  ;;  %v1766_v17 = vld [vmem:[#allocation2 + $0x4c] ss:$12 sps:$4 sm:$0xff]   ;;  %v1782_v20 = vld [vmem:[#allocation2 + $0xc8] ss:$12 sps:$4 sm:$0xff]   ;;  %v1797_v30 = vld [vmem:[#allocation2 + $0x110] ss:$12 sps:$4 sm:$0xff]  }
  0x2e   :  { %157 = vmatprep.mubr.bf16.mxu0 %v1993_v0  ;;  %903 = vmatpush1.bf16.msra.mxu0 %v1755_v8  ;;  %v1783_v21 = vld [vmem:[#allocation2 + $0x8] ss:$12 sps:$4 sm:$0xff]   ;;  %v1767_v22 = vld [vmem:[#allocation2 + $0x60] ss:$12 sps:$4 sm:$0xff]   ;;  %v1770_v26 = vld [vmem:[#allocation2 + $0x78] ss:$12 sps:$4 sm:$0xff]  }
  0x2f   :  { %904 = vmatprep.subr.bf16.mxu0 %v1760_v10  ;;  %210 = vmatprep.mubr.bf16.mxu1 %v1993_v0  ;;  %v1772_v23 = vld [vmem:[#allocation2 + $0x7c] ss:$12 sps:$4 sm:$0xff]   ;;  %v1787_v24 = vld [vmem:[#allocation2 + $0xe0] ss:$12 sps:$4 sm:$0xff]   ;;  %v1792_v27 = vld [vmem:[#allocation2 + $0xf8] ss:$12 sps:$4 sm:$0xff]  }
  0x30   :  { %1611 = vmatprep.subr.bf16.mxu1 %v1782_v20  ;;  %v1788_v25 = vld [vmem:[#allocation2 + $0x20] ss:$12 sps:$4 sm:$0xff]   ;;  %v1793_v28 = vld [vmem:[#allocation2 + $0x38] ss:$12 sps:$4 sm:$0xff]   ;;  %v1798_v31 = vld [vmem:[#allocation2 + $0x50] ss:$12 sps:$4 sm:$0xff]  }
  0x31   :  { %1612 = vmatpush3.bf16.msra.mxu1 %v1783_v21  ;;  %v1775_v29 = vld [vmem:[#allocation2 + $0x94] ss:$12 sps:$4 sm:$0xff]   ;;  %v1773_v32 = vld [vmem:[#allocation2 + $0x90] ss:$12 sps:$4 sm:$0xff]   ;;  %v1778_v33 = vld [vmem:[#allocation2 + $0xac] ss:$12 sps:$4 sm:$0xff]  }
  0x32   :  { %905 = vmatpush1.bf16.msra.mxu0 %v1758_v13  ;;  %1613 = vmatprep.subr.bf16.mxu1 %v1787_v24  ;;  %v1802_v34 = vld [vmem:[#allocation2 + $0x128] ss:$12 sps:$4 sm:$0xff]   ;;  %v1781_v37 = vld [vmem:[#allocation2 + $0xc4] ss:$12 sps:$4 sm:$0xff]   ;;  %v1807_v38 = vld [vmem:[#allocation2 + $0x140] ss:$12 sps:$4 sm:$0xff]  }
  0x33   :  { %906 = vmatprep.subr.bf16.mxu0 %v1763_v14  ;;  %v1803_v35 = vld [vmem:[#allocation2 + $0x68] ss:$12 sps:$4 sm:$0xff]   ;;  %v1779_v39 = vld [vmem:[#allocation2 + $0xc0] ss:$12 sps:$4 sm:$0xff]   ;;  %v1784_v42 = vld [vmem:[#allocation2 + $0xd8] ss:$12 sps:$4 sm:$0xff]  }
  0x34   :  { %v1776_v36 = vld [vmem:[#allocation2 + $0xa8] ss:$12 sps:$4 sm:$0xff]   ;;  %v1808_v40 = vld [vmem:[#allocation2 + $0x80] ss:$12 sps:$4 sm:$0xff]   ;;  %v1789_v44 = vld [vmem:[#allocation2 + $0xf0] ss:$12 sps:$4 sm:$0xff]  }
  0x35   :  { %1468 = vmatmul.mubr.msk.bf16.gmra.mrb[4].mxu0 %vm108_vm0, %v61_v15  ;;  %1470 = vmatmul.mubr.msk.bf16.gmra.mrb[4].mxu1 %vm108_vm0, %v61_v15  ;;  %v1786_v41 = vld [vmem:[#allocation2 + $0xdc] ss:$12 sps:$4 sm:$0xff]   ;;  %v1791_v43 = vld [vmem:[#allocation2 + $0xf4] ss:$12 sps:$4 sm:$0xff]   ;;  %v1796_v45 = vld [vmem:[#allocation2 + $0x10c] ss:$12 sps:$4 sm:$0xff]  }
  0x36   :  { %907 = vmatpush1.bf16.msra.mxu0 %v1761_v16  ;;  %1614 = vmatpush3.bf16.msra.mxu1 %v1788_v25  ;;  %v1794_v46 = vld [vmem:[#allocation2 + $0x108] ss:$12 sps:$4 sm:$0xff]   ;;  %v1801_v47 = vld [vmem:[#allocation2 + $0x124] ss:$12 sps:$4 sm:$0xff]   ;;  %v1799_v48 = vld [vmem:[#allocation2 + $0x120] ss:$12 sps:$4 sm:$0xff]  }
  0x37   :  { %908 = vmatprep.subr.bf16.mxu0 %v1766_v17  ;;  %1615 = vmatprep.subr.bf16.mxu1 %v1792_v27  ;;  %v1806_v49 = vld [vmem:[#allocation2 + $0x13c] ss:$12 sps:$4 sm:$0xff]   ;;  %v1804_v50 = vld [vmem:[#allocation2 + $0x138] ss:$12 sps:$4 sm:$0xff]   ;;  %v1811_v51 = vld [vmem:[#allocation2 + $0x154] ss:$12 sps:$4 sm:$0xff]  }
  0x38   :  { %v1812_v52 = vld [vmem:[#allocation2 + $0x158] ss:$12 sps:$4 sm:$0xff]   ;;  %v1809_v53 = vld [vmem:[#allocation2 + $0x150] ss:$12 sps:$4 sm:$0xff]   ;;  %v1814_v57 = vld [vmem:[#allocation2 + $0x168] ss:$12 sps:$4 sm:$0xff]  }
  0x39   :  { %v1813_v54 = vld [vmem:[#allocation2 + $0x98] ss:$12 sps:$4 sm:$0xff]   ;;  %v1817_v56 = vld [vmem:[#allocation2 + $0x170] ss:$12 sps:$4 sm:$0xff]   ;;  %v1822_v60 = vld [vmem:[#allocation2 + $0x248] ss:$12 sps:$4 sm:$0xff]  }
  0x3a   :  { %909 = vmatpush1.bf16.msra.mxu0 %v1764_v18  ;;  %1616 = vmatpush3.bf16.msra.mxu1 %v1793_v28  ;;  %v1816_v55 = vld [vmem:[#allocation2 + $0x16c] ss:$12 sps:$4 sm:$0xff]   ;;  %v1818_v58 = vld [vmem:[#allocation2 + $0xb0] ss:$12 sps:$4 sm:$0xff]   ;;  %v66_v0 = vld [vmem:[%s2162_s2] sm:$0xf] }
  0x3b   :  { %910 = vmatprep.subr.bf16.mxu0 %v1769_v19  ;;  %1617 = vmatprep.subr.bf16.mxu1 %v1797_v30  ;;  %v1821_v59 = vld [vmem:[#allocation2 + $0x184] ss:$12 sps:$4 sm:$0xff]   ;;  %v74_v1 = vsub.s32 1, %v2090_v62  ;;  %v78_v2 = vsub.s32 2, %v2090_v62  ;;  %v71_v3 = vrot.slane %v66_v0, %v70_v63  ;;  %v82_v4 = vsub.s32 3, %v2090_v62 }
  0x3d   :  { %v75_v5 = vrot.slane %v66_v0, %v74_v1  ;;  %v2105_v7 = vrot.slane %v66_v0, %v78_v2  ;;  %v2107_v10 = vrot.slane %v66_v0, %v82_v4 }
  0x3e   :  { %911 = vmatpush1.bf16.msra.mxu0 %v1767_v22  ;;  %1618 = vmatpush3.bf16.msra.mxu1 %v1798_v31 }
  0x3f   :  { %912 = vmatprep.subr.bf16.mxu0 %v1772_v23  ;;  %1619 = vmatprep.subr.bf16.mxu1 %v1802_v34 }
  0x42   :  { %913 = vmatpush1.bf16.msra.mxu0 %v1770_v26  ;;  %1620 = vmatpush3.bf16.msra.mxu1 %v1803_v35 }
  0x43   :  { %914 = vmatprep.subr.bf16.mxu0 %v1775_v29  ;;  %1621 = vmatprep.subr.bf16.mxu1 %v1807_v38 }
  0x46   :  { %915 = vmatpush1.bf16.msra.mxu0 %v1773_v32  ;;  %1622 = vmatpush3.bf16.msra.mxu1 %v1808_v40  ;;  %v1819_v32 = vld [vmem:[#allocation2 + $0x180] ss:$12 sps:$4 sm:$0xff]  }
  0x47   :  { %916 = vmatprep.subr.bf16.mxu0 %v1778_v33  ;;  %1623 = vmatprep.subr.bf16.mxu1 %v1812_v52  ;;  %v1823_v33 = vld [vmem:[#allocation2 + $0x188] ss:$12 sps:$4 sm:$0xff]  }
  0x4a   :  { %917 = vmatpush1.bf16.msra.mxu0 %v1776_v36  ;;  %1624 = vmatpush3.bf16.msra.mxu1 %v1813_v54  ;;  %v1826_v36 = vld [vmem:[#allocation2 + $0x19c] ss:$12 sps:$4 sm:$0xff]  }
  0x4b   :  { %918 = vmatprep.subr.bf16.mxu0 %v1781_v37  ;;  %1625 = vmatprep.subr.bf16.mxu1 %v1817_v56  ;;  %v1827_v37 = vld [vmem:[#allocation2 + $0x260] ss:$12 sps:$4 sm:$0xff]   ;;  %v1832_v56 = vld [vmem:[#allocation2 + $0x278] ss:$12 sps:$4 sm:$0xff]  }
  0x4e   :  { %919 = vmatpush1.bf16.msra.mxu0 %v1779_v39  ;;  %1626 = vmatpush3.bf16.msra.mxu1 %v1818_v58 }
  0x4f   :  { %920 = vmatprep.subr.bf16.mxu0 %v1786_v41  ;;  %1639 = vmatprep.subr.bf16.mxu1 %v1822_v60 }
  0x52   :  { %921 = vmatpush1.bf16.msra.mxu0 %v1784_v42 }
  0x53   :  { %922 = vmatprep.subr.bf16.mxu0 %v1791_v43 }
  0x56   :  { %923 = vmatpush1.bf16.msra.mxu0 %v1789_v44 }
  0x57   :  { %924 = vmatprep.subr.bf16.mxu0 %v1796_v45 }
  0x5a   :  { %925 = vmatpush1.bf16.msra.mxu0 %v1794_v46 }
  0x5b   :  { %926 = vmatprep.subr.bf16.mxu0 %v1801_v47 }
  0x5e   :  { %927 = vmatpush1.bf16.msra.mxu0 %v1799_v48 }
  0x5f   :  { %928 = vmatprep.subr.bf16.mxu0 %v1806_v49  ;;  %v1824_v49 = vld [vmem:[#allocation2 + $0x198] ss:$12 sps:$4 sm:$0xff]  }
  0x62   :  { %929 = vmatpush1.bf16.msra.mxu0 %v1804_v50  ;;  %v1828_v50 = vld [vmem:[#allocation2 + $0x1a0] ss:$12 sps:$4 sm:$0xff]  }
  0x63   :  { %930 = vmatprep.subr.bf16.mxu0 %v1811_v51 }
  0x66   :  { %931 = vmatpush1.bf16.msra.mxu0 %v1809_v53 }
  0x67   :  { %932 = vmatprep.subr.bf16.mxu0 %v1816_v55  ;;  %v1831_v55 = vld [vmem:[#allocation2 + $0x1b4] ss:$12 sps:$4 sm:$0xff]  }
  0x6a   :  { %933 = vmatpush1.bf16.msra.mxu0 %v1814_v57 }
  0x6b   :  { %955 = vmatprep.subr.bf16.mxu0 %v1821_v59 }
 0x100   :  { %v149_v6 = vpop.f32.mrb[0].mxu0  ;;  %v202_v15 = vpop.f32.mrb[0].mxu1 }
 0x101   :  { %v150_v8 = vadd.f32 %v149_v6, %v71_v3  ;;  %v151_v9 = vpop.f32.mrb[1].mxu0  ;;  %v203_v17 = vadd.f32 %v202_v15, %v2105_v7  ;;  %v204_v18 = vpop.f32.mrb[1].mxu1 }
 0x102   :  { %v152_v11 = vadd.f32 %v151_v9, %v75_v5  ;;  %v153_v12 = vpop.f32.mrb[2].mxu0  ;;  %v205_v21 = vadd.f32 %v204_v18, %v2107_v10  ;;  %v206_v22 = vpop.f32.mrb[2].mxu1  ;;  %v1833_v9 = vld [vmem:[#allocation2 + $0x1b8] ss:$12 sps:$4 sm:$0xff]  }
 0x103   :  { %v154_v13 = vadd.f32 %v153_v12, %v71_v3  ;;  %v155_v14 = vpop.f32.mrb[3].mxu0  ;;  %v221_v19 = vmax.f32 %v150_v8, 0.0  ;;  %v223_v25 = vmax.f32 %v203_v17, 0.0  ;;  %v207_v26 = vadd.f32 %v206_v22, %v2105_v7  ;;  %v208_v27 = vpop.f32.mrb[3].mxu1  ;;  %v1829_v8 = vld [vmem:[#allocation2 + $0x1b0] ss:$12 sps:$4 sm:$0xff]  }
 0x104   :  { %v156_v16 = vadd.f32 %v155_v14, %v75_v5  ;;  %v222_v23 = vmax.f32 %v152_v11, 0.0  ;;  %v224_v29 = vmax.f32 %v205_v21, 0.0  ;;  %v209_v30 = vadd.f32 %v208_v27, %v2107_v10  ;;  %v1837_v14 = vld [vmem:[#allocation2 + $0x290] ss:$12 sps:$4 sm:$0xff]   ;;  %v1843_v21 = vld [vmem:[#allocation2 + $0x1e8] ss:$12 sps:$4 sm:$0xff]  }
 0x105   :  { %v225_v20 = vmax.f32 %v154_v13, 0.0  ;;  %v227_v35 = vmax.f32 %v207_v26, 0.0  ;;  %v1836_v13 = vld [vmem:[#allocation2 + $0x1cc] ss:$12 sps:$4 sm:$0xff]   ;;  %v1838_v17 = vld [vmem:[#allocation2 + $0x1d0] ss:$12 sps:$4 sm:$0xff]  }
 0x106   :  { %v226_v24 = vmax.f32 %v156_v16, 0.0  ;;  %v228_v40 = vmax.f32 %v209_v30, 0.0  ;;  %v1841_v18 = vld [vmem:[#allocation2 + $0x1e4] ss:$12 sps:$4 sm:$0xff]   ;;  %v1846_v22 = vld [vmem:[#allocation2 + $0x1fc] ss:$12 sps:$4 sm:$0xff]  }
 0x107   :  { %v237_v28 = vpack.c.bf16 %v225_v20, %v221_v19  ;;  %v2113_v43 = vpack.c.bf16 %v227_v35, %v223_v25  ;;  %v1842_v19 = vld [vmem:[#allocation2 + $0x2a8] ss:$12 sps:$4 sm:$0xff]   ;;  %v1839_v20 = vld [vmem:[#allocation2 + $0x1e0] ss:$12 sps:$4 sm:$0xff]   ;;  %v1852_v27 = vld [vmem:[#allocation2 + $0x2d8] ss:$12 sps:$4 sm:$0xff]  }
 0x108   :  { %v238_v31 = vpack.c.bf16 %v226_v24, %v222_v23  ;;  %v159_v34 = vpop.f32.mrb[4].mxu0  ;;  %v240_v47 = vpack.c.bf16 %v228_v40, %v224_v29  ;;  %v212_v48 = vpop.f32.mrb[4].mxu1  ;;  %v1847_v23 = vld [vmem:[#allocation2 + $0x2c0] ss:$12 sps:$4 sm:$0xff]   ;;  %v1844_v24 = vld [vmem:[#allocation2 + $0x1f8] ss:$12 sps:$4 sm:$0xff]  }
 0x109   :  { %v160_v38 = vadd.f32 %v159_v34, %v71_v3  ;;  %v161_v39 = vpop.f32.mrb[5].mxu0  ;;  %v213_v53 = vadd.f32 %v212_v48, %v2105_v7  ;;  %v214_v54 = vpop.f32.mrb[5].mxu1  ;;  %v1848_v25 = vld [vmem:[#allocation2 + $0x200] ss:$12 sps:$4 sm:$0xff]   ;;  %v1853_v29 = vld [vmem:[#allocation2 + $0x218] ss:$12 sps:$4 sm:$0xff]  }
 0x10a   :  { %934 = vmatprep.mubr.bf16.mxu0 %v238_v31  ;;  %1040 = vmatprep.mubr.bf16.mxu1 %v238_v31  ;;  %v162_v41 = vadd.f32 %v161_v39, %v75_v5  ;;  %v163_v42 = vpop.f32.mrb[6].mxu0  ;;  %v215_v58 = vadd.f32 %v214_v54, %v2107_v10  ;;  %v216_v59 = vpop.f32.mrb[6].mxu1  ;;  %v1851_v26 = vld [vmem:[#allocation2 + $0x214] ss:$12 sps:$4 sm:$0xff]   ;;  %v1856_v30 = vld [vmem:[#allocation2 + $0x22c] ss:$12 sps:$4 sm:$0xff]  }
 0x10b   :  { %935 = vmatmul.mubr.bf16.vlgmr.msra.gmra.mrb[8].mxu0 %v237_v28  ;;  %1041 = vmatmul.mubr.bf16.vlgmr.msra.gmra.mrb[8].mxu1 %v237_v28  ;;  %v229_v44 = vmax.f32 %v160_v38, 0.0  ;;  %v164_v45 = vadd.f32 %v163_v42, %v71_v3  ;;  %v165_v46 = vpop.f32.mrb[7].mxu0  ;;  %v231_v61 = vmax.f32 %v213_v53, 0.0  ;;  %v217_v0 = vadd.f32 %v216_v59, %v2105_v7  ;;  %v218_v3 = vpop.f32.mrb[7].mxu1  ;;  %v1849_v28 = vld [vmem:[#allocation2 + $0x210] ss:$12 sps:$4 sm:$0xff]  }
 0x10c   :  { %956 = vmatpush1.bf16.msra.mxu0 %v1819_v32  ;;  %1640 = vmatpush3.bf16.msra.mxu1 %v1823_v33  ;;  %v230_v51 = vmax.f32 %v162_v41, 0.0  ;;  %v166_v52 = vadd.f32 %v165_v46, %v75_v5  ;;  %v232_v6 = vmax.f32 %v215_v58, 0.0  ;;  %v219_v5 = vadd.f32 %v218_v3, %v2107_v10  ;;  %v1834_v10 = vld [vmem:[#allocation2 + $0x1c8] ss:$12 sps:$4 sm:$0xff]   ;;  %v1857_v31 = vld [vmem:[#allocation2 + $0x2f0] ss:$12 sps:$4 sm:$0xff]  }
 0x10d   :  { %957 = vmatprep.subr.bf16.mxu0 %v1826_v36  ;;  %1641 = vmatprep.subr.bf16.mxu1 %v1827_v37  ;;  %v233_v57 = vmax.f32 %v164_v45, 0.0  ;;  %v235_v12 = vmax.f32 %v217_v0, 0.0  ;;  %v1854_v32 = vld [vmem:[#allocation2 + $0x228] ss:$12 sps:$4 sm:$0xff]   ;;  %v1858_v33 = vld [vmem:[#allocation2 + $0x230] ss:$12 sps:$4 sm:$0xff]  }
 0x10e   :  { %v234_v60 = vmax.f32 %v166_v52, 0.0  ;;  %v236_v15 = vmax.f32 %v219_v5, 0.0  ;;  %v1861_v34 = vld [vmem:[#allocation2 + $0x244] ss:$12 sps:$4 sm:$0xff]   ;;  %v1859_v35 = vld [vmem:[#allocation2 + $0x240] ss:$12 sps:$4 sm:$0xff]  }
 0x10f   :  { %v241_v4 = vpack.c.bf16 %v233_v57, %v229_v44  ;;  %v2119_v16 = vpack.c.bf16 %v235_v12, %v231_v61  ;;  %v1864_v36 = vld [vmem:[#allocation2 + $0x25c] ss:$12 sps:$4 sm:$0xff]   ;;  %v1862_v37 = vld [vmem:[#allocation2 + $0x258] ss:$12 sps:$4 sm:$0xff]   ;;  %v1867_v38 = vld [vmem:[#allocation2 + $0x274] ss:$12 sps:$4 sm:$0xff]  }
 0x110   :  { %958 = vmatpush1.bf16.msra.mxu0 %v1824_v49  ;;  %1642 = vmatpush3.bf16.msra.mxu1 %v1828_v50  ;;  %v242_v11 = vpack.c.bf16 %v234_v60, %v230_v51  ;;  %v2121_v7 = vpack.c.bf16 %v236_v15, %v232_v6  ;;  %v1865_v39 = vld [vmem:[#allocation2 + $0x270] ss:$12 sps:$4 sm:$0xff]   ;;  %v1870_v40 = vld [vmem:[#allocation2 + $0x28c] ss:$12 sps:$4 sm:$0xff]   ;;  %v1868_v41 = vld [vmem:[#allocation2 + $0x288] ss:$12 sps:$4 sm:$0xff]  }
 0x111   :  { %959 = vmatprep.subr.bf16.mxu0 %v1831_v55  ;;  %1643 = vmatprep.subr.bf16.mxu1 %v1832_v56  ;;  %v1873_v42 = vld [vmem:[#allocation2 + $0x2a4] ss:$12 sps:$4 sm:$0xff]   ;;  %v1871_v44 = vld [vmem:[#allocation2 + $0x2a0] ss:$12 sps:$4 sm:$0xff]   ;;  %v1876_v45 = vld [vmem:[#allocation2 + $0x2bc] ss:$12 sps:$4 sm:$0xff]  }
 0x112   :  { %1048 = vmatprep.mubr.bf16.mxu1 %v242_v11  ;;  %944 = vmatprep.mubr.bf16.mxu0 %v242_v11  ;;  %v1874_v46 = vld [vmem:[#allocation2 + $0x2b8] ss:$12 sps:$4 sm:$0xff]   ;;  %v1877_v48 = vld [vmem:[#allocation2 + $0x2d0] ss:$12 sps:$4 sm:$0xff]   ;;  %v1880_v50 = vld [vmem:[#allocation2 + $0x2e8] ss:$12 sps:$4 sm:$0xff]  }
 0x113   :  { %1049 = vmatmul.mubr.bf16.gmra.mrb[12].mxu1 %v241_v4  ;;  %945 = vmatmul.mubr.bf16.gmra.mrb[12].mxu0 %v241_v4  ;;  %v1882_v49 = vld [vmem:[#allocation2 + $0x2ec] ss:$12 sps:$4 sm:$0xff]   ;;  %v1883_v51 = vld [vmem:[#allocation5 + $0x40] sm:$0xff]   ;;  %v1887_v55 = vld [vmem:[#allocation5 + $0x50] sm:$0xff]  }
 0x114   :  { %960 = vmatpush1.bf16.msra.mxu0 %v1829_v8  ;;  %1644 = vmatpush3.bf16.msra.mxu1 %v1833_v9  ;;  %v1884_v52 = vld [vmem:[#allocation5] sm:$0xff]   ;;  %v1885_v53 = vld [vmem:[#allocation5 + $0x48] sm:$0xff]   ;;  %v1888_v56 = vld [vmem:[#allocation5 + $0x10] sm:$0xff]  }
 0x115   :  { %961 = vmatprep.subr.bf16.mxu0 %v1836_v13  ;;  %1645 = vmatprep.subr.bf16.mxu1 %v1837_v14  ;;  %v1886_v54 = vld [vmem:[#allocation5 + $0x8] sm:$0xff]   ;;  %v1889_v57 = vld [vmem:[#allocation5 + $0x58] sm:$0xff]   ;;  %v1892_v59 = vld [vmem:[#allocation5 + $0x20] sm:$0xff]  }
 0x116   :  { %1089 = vmatprep.mubr.bf16.mxu1 %v240_v47  ;;  %987 = vmatprep.mubr.bf16.mxu0 %v240_v47  ;;  %v1879_v47 = vld [vmem:[#allocation2 + $0x2d4] ss:$12 sps:$4 sm:$0xff]   ;;  %v1890_v58 = vld [vmem:[#allocation5 + $0x18] sm:$0xff]   ;;  %v1893_v60 = vld [vmem:[#allocation5 + $0x68] sm:$0xff]  }
 0x117   :  { %v1894_v61 = vld [vmem:[#allocation5 + $0x28] sm:$0xff]   ;;  %v1895_v0 = vld [vmem:[#allocation5 + $0x70] sm:$0xff]   ;;  %v1897_v4 = vld [vmem:[#allocation5 + $0x78] sm:$0xff]  }
 0x118   :  { %962 = vmatpush1.bf16.msra.mxu0 %v1834_v10  ;;  %1646 = vmatpush3.bf16.msra.mxu1 %v1838_v17  ;;  %v1896_v3 = vld [vmem:[#allocation5 + $0x30] sm:$0xff]   ;;  %v1898_v6 = vld [vmem:[#allocation5 + $0x38] sm:$0xff]   ;;  %v2129_v5 = vld [vmem:[#allocation5 + $0x80] sm:$0xff]  }
 0x119   :  { %963 = vmatprep.subr.bf16.mxu0 %v1841_v18  ;;  %1647 = vmatprep.subr.bf16.mxu1 %v1842_v19  ;;  %v373_v19 = vld [vmem:[%s2164_s4] sm:$0x7] }
 0x11c   :  { %964 = vmatpush1.bf16.msra.mxu0 %v1839_v20  ;;  %1648 = vmatpush3.bf16.msra.mxu1 %v1843_v21  ;;  %v386_v20 = vrot.slane %v373_v19, %v78_v2 }
 0x11d   :  { %965 = vmatprep.subr.bf16.mxu0 %v1846_v22  ;;  %1649 = vmatprep.subr.bf16.mxu1 %v1847_v23 }
 0x120   :  { %966 = vmatpush1.bf16.msra.mxu0 %v1844_v24  ;;  %1650 = vmatpush3.bf16.msra.mxu1 %v1848_v25 }
 0x121   :  { %967 = vmatprep.subr.bf16.mxu0 %v1851_v26  ;;  %1651 = vmatprep.subr.bf16.mxu1 %v1852_v27 }
 0x124   :  { %968 = vmatpush1.bf16.msra.mxu0 %v1849_v28  ;;  %1652 = vmatpush3.bf16.msra.mxu1 %v1853_v29 }
 0x125   :  { %969 = vmatprep.subr.bf16.mxu0 %v1856_v30  ;;  %1653 = vmatprep.subr.bf16.mxu1 %v1857_v31 }
 0x128   :  { %970 = vmatpush1.bf16.msra.mxu0 %v1854_v32  ;;  %1654 = vmatpush3.bf16.msra.mxu1 %v1858_v33 }
 0x129   :  { %971 = vmatprep.subr.bf16.mxu0 %v1861_v34  ;;  %1667 = vmatprep.subr.bf16.mxu1 %v1883_v51 }
 0x12b   :  { %1090 = vmatmul.mubr.bf16.vlgmr.msra.gmra.mrb[16].mxu1 %v2113_v43 }
 0x12c   :  { %972 = vmatpush1.bf16.msra.mxu0 %v1859_v35  ;;  %1097 = vmatprep.mubr.bf16.mxu1 %v2121_v7 }
 0x12d   :  { %973 = vmatprep.subr.bf16.mxu0 %v1864_v36  ;;  %1668 = vmatpush3.bf16.msra.mxu1 %v1884_v52 }
 0x12e   :  { %1669 = vmatprep.subr.bf16.mxu1 %v1885_v53 }
 0x130   :  { %974 = vmatpush1.bf16.msra.mxu0 %v1862_v37 }
 0x131   :  { %975 = vmatprep.subr.bf16.mxu0 %v1867_v38  ;;  %1670 = vmatpush3.bf16.msra.mxu1 %v1886_v54 }
 0x132   :  { %1671 = vmatprep.subr.bf16.mxu1 %v1887_v55 }
 0x133   :  { %1098 = vmatmul.mubr.bf16.gmra.mrb[20].mxu1 %v2119_v16 }
 0x134   :  { %976 = vmatpush1.bf16.msra.mxu0 %v1865_v39 }
 0x135   :  { %977 = vmatprep.subr.bf16.mxu0 %v1870_v40  ;;  %1672 = vmatpush3.bf16.msra.mxu1 %v1888_v56 }
 0x136   :  { %1673 = vmatprep.subr.bf16.mxu1 %v1889_v57 }
 0x138   :  { %978 = vmatpush1.bf16.msra.mxu0 %v1868_v41 }
 0x139   :  { %979 = vmatprep.subr.bf16.mxu0 %v1873_v42  ;;  %1674 = vmatpush3.bf16.msra.mxu1 %v1890_v58 }
 0x13c   :  { %980 = vmatpush1.bf16.msra.mxu0 %v1871_v44 }
 0x13d   :  { %981 = vmatprep.subr.bf16.mxu0 %v1876_v45 }
 0x140   :  { %982 = vmatpush1.bf16.msra.mxu0 %v1874_v46 }
 0x141   :  { %983 = vmatprep.subr.bf16.mxu0 %v1879_v47  ;;  %v378_v47 = vrot.slane %v373_v19, %v70_v63 }
 0x144   :  { %984 = vmatpush1.bf16.msra.mxu0 %v1877_v48  ;;  %v382_v48 = vrot.slane %v373_v19, %v74_v1  ;;  %v1906_v19 = vld [vmem:[#allocation5 + $0xb8] sm:$0xff]  }
 0x145   :  { %985 = vmatprep.subr.bf16.mxu0 %v1882_v49 }
 0x148   :  { %986 = vmatpush1.bf16.msra.mxu0 %v1880_v50 }
 0x14b   :  { %988 = vmatmul.mubr.bf16.vlgmr.msra.gmra.mrb[8].mxu0 %v2113_v43  ;;  %v1891_v43 = vld [vmem:[#allocation5 + $0x60] sm:$0xff]  }
 0x14c   :  { %997 = vmatprep.mubr.bf16.mxu0 %v2121_v7  ;;  %1675 = vmatprep.subr.bf16.mxu1 %v1891_v43 }
 0x14d   :  { %1676 = vmatpush3.bf16.msra.mxu1 %v1892_v59 }
 0x14e   :  { %1677 = vmatprep.subr.bf16.mxu1 %v1893_v60 }
 0x151   :  { %1678 = vmatpush3.bf16.msra.mxu1 %v1894_v61 }
 0x152   :  { %1679 = vmatprep.subr.bf16.mxu1 %v1895_v0 }
 0x153   :  { %998 = vmatmul.mubr.bf16.gmra.mrb[12].mxu0 %v2119_v16 }
 0x155   :  { %1680 = vmatpush3.bf16.msra.mxu1 %v1896_v3 }
 0x156   :  { %1681 = vmatprep.subr.bf16.mxu1 %v1897_v4  ;;  %v1900_v4 = vld [vmem:[#allocation5 + $0x88] sm:$0xff]  }
 0x159   :  { %1682 = vmatpush3.bf16.msra.mxu1 %v1898_v6 }
 0x15a   :  { %1705 = vmatprep.subr.bf16.mxu1 %v2129_v5 }
 0x1de   :  { %v1627_v8 = vpop.f32.mrb[8].mxu1 }
 0x1df   :  { %v1628_v9 = vpop.f32.mrb[9].mxu1 }
 0x1e0   :  { %v1629_v11 = vadd.f32 %v1628_v9, %v1627_v8  ;;  %v1630_v12 = vpop.f32.mrb[10].mxu1 }
 0x1e1   :  { %v1631_v13 = vpop.f32.mrb[11].mxu1 }
 0x1e2   :  { %v1632_v14 = vadd.f32 %v1631_v13, %v1630_v12  ;;  %v1043_v23 = vadd.f32 %v1629_v11, %v386_v20  ;;  %v1901_v13 = vld [vmem:[#allocation5 + $0x90] sm:$0xff]  }
 0x1e4   :  { %v1046_v27 = vadd.f32 %v1632_v14, %v386_v20 }
 0x1e6   :  { %v1633_v15 = vpop.f32.mrb[12].mxu1 }
 0x1e7   :  { %v1634_v16 = vpop.f32.mrb[13].mxu1 }
 0x1e8   :  { %v1635_v7 = vadd.f32 %v1634_v16, %v1633_v15  ;;  %v1636_v10 = vpop.f32.mrb[14].mxu1 }
 0x1e9   :  { %v1637_v17 = vpop.f32.mrb[15].mxu1 }
 0x1ea   :  { %v1638_v18 = vadd.f32 %v1637_v17, %v1636_v10  ;;  %v1051_v31 = vadd.f32 %v1635_v7, %v386_v20  ;;  %v1902_v10 = vld [vmem:[#allocation5 + $0x98] sm:$0xff]   ;;  %v1903_v17 = vld [vmem:[#allocation5 + $0xa0] sm:$0xff]  }
 0x1ec   :  { %v1054_v36 = vadd.f32 %v1638_v18, %v386_v20  ;;  %v1905_v18 = vld [vmem:[#allocation5 + $0xb0] sm:$0xff]  }
 0x1fe   :  { %v1655_v21 = vpop.f32.mrb[16].mxu1 }
 0x1ff   :  { %v1656_v22 = vpop.f32.mrb[17].mxu1 }
 0x200   :  { %v1657_v24 = vadd.f32 %v1656_v22, %v1655_v21  ;;  %v1658_v25 = vpop.f32.mrb[18].mxu1 }
 0x201   :  { %v1659_v26 = vpop.f32.mrb[19].mxu1 }
 0x202   :  { %v1092_v28 = vadd.f32 %v1657_v24, %v1043_v23  ;;  %v1660_v29 = vadd.f32 %v1659_v26, %v1658_v25 }
 0x204   :  { %v1095_v30 = vadd.f32 %v1660_v29, %v1046_v27  ;;  %v1108_v32 = vmax.f32 %v1092_v28, 0.0 }
 0x206   :  { %v1111_v33 = vmax.f32 %v1095_v30, 0.0  ;;  %v1661_v34 = vpop.f32.mrb[20].mxu1 }
 0x207   :  { %v1662_v35 = vpop.f32.mrb[21].mxu1 }
 0x208   :  { %v1663_v37 = vadd.f32 %v1662_v35, %v1661_v34  ;;  %v1664_v38 = vpop.f32.mrb[22].mxu1  ;;  %v1120_v39 = vpack.c.bf16 %v1111_v33, %v1108_v32  ;;  %v1567_v32 = vld [vmem:[%s2166_s6] ss:$0 sm:$0xff]  ;;  %s1450_s6 = sshll.u32 %s1994_s22, 4  ;;  %s1451_s6 = int_to_ptr.vmem [resolvable:$true] %s1450_s6 }
 0x209   :  { %v1665_v2 = vpop.f32.mrb[23].mxu1  ;;  %s1959_s23 = scalar_lea.vmem %s1451_s6, 256  ;;  %p1964_p3 = scmp.lt.s32.totalorder %s1451_s6, %s1451_s6 }
 0x20a   :  { %v1100_v40 = vadd.f32 %v1663_v37, %v1051_v31  ;;  %v1666_v41 = vadd.f32 %v1665_v2, %v1664_v38  ;;  %p1960_p2 = scmp.ne.s32.totalorder %s1451_s6, %s1959_s23  ;;  %p1965_p4 = scmp.lt.s32.totalorder %s1959_s23, %s1959_s23 }
 0x20c   :  { %v1114_v42 = vmax.f32 %v1100_v40, 0.0  ;;  %v1103_v44 = vadd.f32 %v1666_v41, %v1054_v36  ;;  %p1966_p5 = por %p1965_p4, %p1964_p3 }
 0x20e   :  { %v1117_v45 = vmax.f32 %v1103_v44, 0.0  ;;  %p1967_p6 = pnand %p1966_p5, %p1960_p2 }
 0x210   :  { %v1123_v46 = vpack.c.bf16 %v1117_v45, %v1114_v42 }
 0x21e   :  { %v989_v49 = vpop.f32.mrb[8].mxu0 }
 0x21f   :  { %v1725_v50 = vadd.f32 %v989_v49, %v378_v47  ;;  %v991_v51 = vpop.f32.mrb[9].mxu0 }
 0x220   :  { %v1726_v52 = vadd.f32 %v991_v51, %v382_v48  ;;  %v993_v53 = vpop.f32.mrb[10].mxu0 }
 0x221   :  { %v1727_v54 = vadd.f32 %v993_v53, %v378_v47  ;;  %v995_v55 = vpop.f32.mrb[11].mxu0  ;;  %v1106_v57 = vmax.f32 %v1725_v50, 0.0 }
 0x222   :  { %v1728_v56 = vadd.f32 %v995_v55, %v382_v48  ;;  %v1107_v43 = vmax.f32 %v1726_v52, 0.0 }
 0x223   :  { %v1109_v58 = vmax.f32 %v1727_v54, 0.0 }
 0x224   :  { %v1110_v59 = vmax.f32 %v1728_v56, 0.0 }
 0x225   :  { %v1118_v60 = vpack.c.bf16 %v1109_v58, %v1106_v57 }
 0x226   :  { %v1119_v61 = vpack.c.bf16 %v1110_v59, %v1107_v43  ;;  %v999_v0 = vpop.f32.mrb[12].mxu0 }
 0x227   :  { %v1729_v3 = vadd.f32 %v999_v0, %v378_v47  ;;  %v1001_v63 = vpop.f32.mrb[13].mxu0 }
 0x228   :  { %v1730_v62 = vadd.f32 %v1001_v63, %v382_v48  ;;  %v1003_v1 = vpop.f32.mrb[14].mxu0  ;;  %1355 = vmatprep.mubr.bf16.mxu1 %v1119_v61 }
 0x229   :  { %v1731_v6 = vadd.f32 %v1003_v1, %v378_v47  ;;  %v1005_v8 = vpop.f32.mrb[15].mxu0  ;;  %1356 = vmatmul.mubr.bf16.vlgmr.msra.gmra.mrb[24].mxu1 %v1118_v60  ;;  %v1112_v11 = vmax.f32 %v1729_v3, 0.0 }
 0x22a   :  { %v1732_v9 = vadd.f32 %v1005_v8, %v382_v48  ;;  %1706 = vmatpush3.bf16.msra.mxu1 %v2129_v5  ;;  %v1113_v14 = vmax.f32 %v1730_v62, 0.0  ;;  %v1904_v5 = vld [vmem:[#allocation5 + $0xa8] sm:$0xff]  }
 0x22b   :  { %v1115_v12 = vmax.f32 %v1731_v6, 0.0  ;;  %1707 = vmatprep.subr.bf16.mxu1 %v1900_v4 }
 0x22c   :  { %v1116_v15 = vmax.f32 %v1732_v9, 0.0 }
 0x22d   :  { %v1121_v16 = vpack.c.bf16 %v1115_v12, %v1112_v11 }
 0x22e   :  { %v1122_v7 = vpack.c.bf16 %v1116_v15, %v1113_v14  ;;  %1708 = vmatpush3.bf16.msra.mxu1 %v1900_v4 }
 0x22f   :  { %1709 = vmatprep.subr.bf16.mxu1 %v1901_v13 }
 0x230   :  { %1363 = vmatprep.mubr.bf16.mxu1 %v1122_v7 }
 0x231   :  { %1364 = vmatmul.mubr.bf16.gmra.mrb[28].mxu1 %v1121_v16 }
 0x232   :  { %1710 = vmatpush3.bf16.msra.mxu1 %v1901_v13  ;;  %1721 = vmatprep.mubr.bf16.mxu1 %v1120_v39 }
 0x233   :  { %1711 = vmatprep.subr.bf16.mxu1 %v1902_v10 }
 0x236   :  { %1712 = vmatpush3.bf16.msra.mxu1 %v1902_v10 }
 0x237   :  { %1713 = vmatprep.subr.bf16.mxu1 %v1903_v17 }
 0x23a   :  { %1714 = vmatpush3.bf16.msra.mxu1 %v1903_v17 }
 0x23b   :  { %1715 = vmatprep.subr.bf16.mxu1 %v1904_v5 }
 0x23e   :  { %1716 = vmatpush3.bf16.msra.mxu1 %v1904_v5 }
 0x23f   :  { %1717 = vmatprep.subr.bf16.mxu1 %v1905_v18 }
 0x242   :  { %1718 = vmatpush3.bf16.msra.mxu1 %v1905_v18 }
 0x243   :  { %1719 = vmatprep.subr.bf16.mxu1 %v1906_v19 }
 0x246   :  { %1720 = vmatpush3.bf16.msra.mxu1 %v1906_v19 }
 0x249   :  { %1722 = vmatmul.mubr.bf16.vlgmr.msra.gmra.mrb[32].mxu1 %v1123_v46 }
 0x2fc   :  { %v1683_v20 = vpop.f32.mrb[24].mxu1 }
 0x2fd   :  { %v1684_v21 = vpop.f32.mrb[25].mxu1 }
 0x2fe   :  { %v1685_v22 = vadd.f32 %v1684_v21, %v1683_v20  ;;  %v1686_v23 = vpop.f32.mrb[26].mxu1 }
 0x2ff   :  { %v1687_v24 = vpop.f32.mrb[27].mxu1 }
 0x300   :  { %v1688_v25 = vadd.f32 %v1687_v24, %v1686_v23  ;;  %v1358_v35 = vadd.f32 %v1685_v22, %v1567_v32 }
 0x302   :  { %v1361_v40 = vadd.f32 %v1688_v25, %v1567_v32 }
 0x304   :  { %v1689_v26 = vpop.f32.mrb[28].mxu1 }
 0x305   :  { %v1690_v27 = vpop.f32.mrb[29].mxu1 }
 0x306   :  { %v1691_v28 = vadd.f32 %v1690_v27, %v1689_v26  ;;  %v1692_v29 = vpop.f32.mrb[30].mxu1 }
 0x307   :  { %v1693_v30 = vpop.f32.mrb[31].mxu1 }
 0x308   :  { %v1694_v31 = vadd.f32 %v1693_v30, %v1692_v29  ;;  %v1366_v33 = vadd.f32 %v1691_v28, %v1567_v32 }
 0x30a   :  { %v1369_v38 = vadd.f32 %v1694_v31, %v1567_v32 }
 0x31c   :  { %v1723_v34 = vpop.f32.mrb[32].mxu1 }
 0x31d   :  { %v1415_v36 = vadd.f32 %v1723_v34, %v1366_v33  ;;  %v1406_v37 = vpop.f32.mrb[33].mxu1 }
 0x31e   :  { %v1407_v39 = vadd.f32 %v1406_v37, %v1358_v35  ;;  %v1724_v2 = vpop.f32.mrb[34].mxu1 }
 0x31f   :  { %1907 = vtanh.f32 %v1415_v36  ;;  %v1418_v41 = vadd.f32 %v1724_v2, %v1369_v38  ;;  %v1409_v42 = vpop.f32.mrb[35].mxu1 }
 0x320   :  { %1909 = vtanh.f32 %v1407_v39  ;;  %v1410_v44 = vadd.f32 %v1409_v42, %v1361_v40 }
 0x321   :  { %1911 = vtanh.f32 %v1418_v41 }
 0x322   :  { %1913 = vtanh.f32 %v1410_v44 }
 0x329   :  { %v1908_v45 = vpop.eup %1907 }
 0x32a   :  { %v1910_v46 = vpop.eup %1909 }
 0x32b   :  { %v1912_v47 = vpop.eup %1911 }
 0x32c   :  { %v1914_v48 = vpop.eup %1913  ;;  %v1608_v49 = vpack.c.bf16 %v1912_v47, %v1908_v45 }
 0x32d   :  { %v1603_v50 = vpack.c.bf16 %v1914_v48, %v1910_v46 }
 0x32e   :  { %1610 = vst [vmem:[#allocation7 + $0x8] sm:$0xff] %v1608_v49  }
 0x32f   :  { %1604 = vst [vmem:[#allocation7] sm:$0xff] %v1603_v50  }
 0x330   :  { %1970 = shalt.err (!%p1967_p6)
}
 0x331   :  { %s1971_s27 = scalar_lea.hbm %s2167_s7, 256 }
 0x332   :  { %p1972_p7 = scmp.ne.s32.totalorder %s2167_s7, %s1971_s27  ;;  %p1975_p8 = scmp.lt.u32.totalorder %s1971_s27, %s2167_s7 }
 0x334   :  { %p1977_p9 = pnand %p1975_p8, %p1972_p7 }
 0x336   :  { %1980 = shalt.err (!%p1977_p9)
}
 0x337   :  { %1456 = dma.vmem_to_hbm [thread:$0]  %s1451_s6, 256, %s2167_s7, [#allocation4], %s1991_s3, %s1991_s3, %s1992_s25  }
 0x338   :  { %1985 = dma.done.wait [#allocation4], 256  }
 0x339   :  { %1986 = vsyncadd [#allocation4], 4294967040 }
 0x33a   :  { %1460 = vsyncpa [#allocation3], 1 }
 0x33b   :  { %1461 = vsyncpa [#allocation6], 1 }
 0x33c   :  { %1462 = vsyncpa [#allocation4], 1 }

</bundles_post_ra>
